<compile_context>
chip_gen: v5e
topology: v5e:2x2
jax: 0.10.0
libtpu: 0.0.40
codegen_flags: <defaults>
</compile_context>

<pallas_src>
import functools

import jax
import jax.numpy as jnp
from jax import lax
from jax.experimental import pallas as pl
from jax.experimental.pallas import tpu as pltpu


def _round_up(n, m):
    return ((n + m - 1) // m) * m


def _sublane_multiple(dtype):
    itemsize = jnp.dtype(dtype).itemsize
    return {4: 8, 2: 16, 1: 32}.get(itemsize, 8)


def _gap_kernel_fused(x_ref, o_ref, *, inv_hw, valid_hw, tile_hw):
    """Single reduction block per row-tile: sum, scale, store. No scratch."""
    x = x_ref[...]
    if valid_hw < tile_hw:
        # OOB lanes of the (clipped) edge block are unspecified -> mask them.
        lane = lax.broadcasted_iota(jnp.int32, x.shape, dimension=1)
        x = jnp.where(lane < valid_hw, x, jnp.zeros_like(x))
    s = jnp.sum(x, axis=-1, keepdims=True, dtype=jnp.float32)
    o_ref[...] = (s * inv_hw).astype(o_ref.dtype)


def _gap_kernel_acc(x_ref, o_ref, acc_ref, *, inv_hw, hw, tile_hw):
    """Multi-block reduction: accumulate f32 row sums, finalize at last k."""
    k = pl.program_id(1)

    @pl.when(k == 0)
    def _():
        acc_ref[...] = jnp.zeros_like(acc_ref)

    x = x_ref[...]
    if hw % tile_hw != 0:
        # Only the last k block has a ragged tail; rem >= tile_hw otherwise,
        # so the mask is all-true there (VPU filler under an HBM-bound loop).
        rem = hw - k * tile_hw
        lane = lax.broadcasted_iota(jnp.int32, x.shape, dimension=1)
        x = jnp.where(lane < rem, x, jnp.zeros_like(x))

    acc_ref[...] += jnp.sum(x, axis=-1, keepdims=True, dtype=jnp.float32)

    @pl.when(k == pl.num_programs(1) - 1)
    def _():
        o_ref[...] = (acc_ref[...] * inv_hw).astype(o_ref.dtype)


def global_avg_pool2d(x, *, tile_bytes=8 * 1024 * 1024):
    """x: (B, C, H, W) -> (B, C, 1, 1), mean over H and W."""
    B, C, H, W = x.shape
    rows = B * C
    hw = H * W
    dtype = x.dtype
    itemsize = jnp.dtype(dtype).itemsize
    sublane = _sublane_multiple(dtype)

    # Lane-dense slab: reduction axis is the last (lane) axis.
    x2d = x.reshape(rows, hw)

    # --- tile selection ------------------------------------------------------
    # Reduction tile: multiple of 128, as large as possible while still
    # admitting at least `sublane` rows inside the per-tile byte budget.
    hw_128 = _round_up(hw, 128)
    max_tile_hw = max(128, (tile_bytes // (sublane * itemsize)) // 128 * 128)
    tile_hw = min(hw_128, max_tile_hw)

    # Row tile: fill the byte budget, rounded to the dtype's sublane multiple,
    # capped so the "parallel" row axis keeps >=4 grid steps when rows allow
    # (v7x megacore), and never larger than the sublane-rounded row count.
    rows_s = _round_up(rows, sublane)
    tile_r = max(sublane,
                 (tile_bytes // (tile_hw * itemsize)) // sublane * sublane)
    row_cap = max(sublane, (rows // 4) // sublane * sublane)
    tile_r = min(tile_r, row_cap, rows_s)

    grid_r = pl.cdiv(rows, tile_r)
    grid_k = pl.cdiv(hw, tile_hw)

    inv_hw = 1.0 / float(hw)

    cost = pl.CostEstimate(
        flops=int(rows) * int(hw),
        transcendentals=0,
        bytes_accessed=int(rows) * int(hw) * itemsize + int(rows) * itemsize,
    )

    # Explicit VMEM limit: double-buffered input tiles + headroom for the tiny
    # (tile_r, 1) output/accumulator and internal scratch.  16 MiB floor keeps
    # small-shape compiles unconstrained; 2*8 MiB + 4 MiB stays well inside
    # v7x's 64 MiB physical VMEM and above v5e's 16 MiB scoped default.
    tile_in_bytes = tile_r * tile_hw * itemsize
    vmem_limit = max(16 * 1024 * 1024,
                     int(2 * tile_in_bytes + 4 * 1024 * 1024))

    if grid_k == 1:
        # Fast path: whole hw reduces in one block -> no accumulator traffic.
        kernel = functools.partial(_gap_kernel_fused, inv_hw=inv_hw,
                                   valid_hw=hw, tile_hw=tile_hw)
        out2d = pl.pallas_call(
            kernel,
            out_shape=jax.ShapeDtypeStruct((rows, 1), dtype),
            grid_spec=pltpu.PrefetchScalarGridSpec(
                num_scalar_prefetch=0,
                grid=(grid_r,),
                in_specs=[pl.BlockSpec((tile_r, tile_hw), lambda i: (i, 0))],
                out_specs=pl.BlockSpec((tile_r, 1), lambda i: (i, 0)),
            ),
            compiler_params=pltpu.CompilerParams(
                dimension_semantics=("parallel",),
                vmem_limit_bytes=vmem_limit,
            ),
            cost_estimate=cost,
        )(x2d)
    else:
        # Large-hw path: reduction axis last, output block resident across k.
        kernel = functools.partial(_gap_kernel_acc, inv_hw=inv_hw, hw=hw,
                                   tile_hw=tile_hw)
        out2d = pl.pallas_call(
            kernel,
            out_shape=jax.ShapeDtypeStruct((rows, 1), dtype),
            grid_spec=pltpu.PrefetchScalarGridSpec(
                num_scalar_prefetch=0,
                grid=(grid_r, grid_k),
                in_specs=[pl.BlockSpec((tile_r, tile_hw),
                                       lambda i, k: (i, k))],
                out_specs=pl.BlockSpec((tile_r, 1), lambda i, k: (i, 0)),
                scratch_shapes=[pltpu.VMEM((tile_r, 1), jnp.float32)],
            ),
            compiler_params=pltpu.CompilerParams(
                dimension_semantics=("parallel", "arbitrary"),
                vmem_limit_bytes=vmem_limit,
            ),
            cost_estimate=cost,
        )(x2d)

    return out2d.reshape(B, C, 1, 1)


if __name__ == "__main__":
    key = jax.random.PRNGKey(0)

    # Primary shape implied by the module usage (fused single-k path).
    B, C, H, W = 2, 4, 16, 16
    x = jax.random.normal(key, (B, C, H, W), dtype=jnp.float32)
    out = jax.block_until_ready(global_avg_pool2d(x))
    ref = jnp.mean(x, axis=(2, 3), keepdims=True)
    assert out.shape == (B, C, 1, 1), out.shape
    assert jnp.allclose(out, ref, atol=1e-6, rtol=1e-5)

    # Ragged shape (exercises the in-kernel lane mask + clipped edge blocks).
    x2 = jax.random.normal(jax.random.PRNGKey(1), (2, 3, 7, 9),
                           dtype=jnp.float32)
    out2 = jax.block_until_ready(global_avg_pool2d(x2))
    ref2 = jnp.mean(x2, axis=(2, 3), keepdims=True)
    assert out2.shape == (2, 3, 1, 1), out2.shape
    assert jnp.allclose(out2, ref2, atol=1e-6, rtol=1e-5)

    # Force the multi-block reduction (accumulator) path with a small budget.
    x3 = jax.random.normal(jax.random.PRNGKey(2), (2, 4, 48, 48),
                           dtype=jnp.float32)
    out3 = jax.block_until_ready(global_avg_pool2d(x3, tile_bytes=64 * 1024))
    ref3 = jnp.mean(x3, axis=(2, 3), keepdims=True)
    assert out3.shape == (2, 4, 1, 1), out3.shape
    assert jnp.allclose(out3, ref3, atol=1e-6, rtol=1e-5)

    print("KERNEL_OK")
</pallas_src>

<mosaic_0001>
module attributes {stable_mosaic.version = 11 : i64} {
  func.func @_gap_kernel_fused(%arg0: i32, %arg1: memref<8x256xf32, #tpu.memory_space<vmem>>, %arg2: memref<8x1xf32, #tpu.memory_space<vmem>>) attributes {dimension_semantics = [#tpu.dimension_semantics<parallel>], iteration_bounds = array<i64: 1>, scalar_prefetch = 0 : i64, scratch_operands = 0 : i64, tpu.core_type = #tpu.core_type<tc>, window_params = [{transform_indices = @transform_0, window_bounds = array<i64: 8, 256>}, {transform_indices = @transform_1, window_bounds = array<i64: 8, 1>}]} {
    %c0 = arith.constant 0 : index
    %c0_0 = arith.constant 0 : index
    %0 = vector.load %arg1[%c0, %c0_0] : memref<8x256xf32, #tpu.memory_space<vmem>>, vector<8x256xf32>
    %cst = arith.constant dense<0.000000e+00> : vector<8xf32>
    %1 = vector.multi_reduction <add>, %0, %cst [1] : vector<8x256xf32> to vector<8xf32>
    %2 = vector.shape_cast %1 : vector<8xf32> to vector<8x1xf32>
    %cst_1 = arith.constant 3.906250e-03 : f32
    %3 = vector.broadcast %cst_1 : f32 to vector<8x1xf32>
    %4 = arith.mulf %2, %3 : vector<8x1xf32>
    %c0_2 = arith.constant 0 : index
    %c0_3 = arith.constant 0 : index
    %5 = vector.load %arg2[%c0_2, %c0_3] : memref<8x1xf32, #tpu.memory_space<vmem>>, vector<8x1xf32>
    tpu.vector_store %arg2[%c0_2, %c0_3], %4 {strides = array<i32>} : memref<8x1xf32, #tpu.memory_space<vmem>>, vector<8x1xf32>,
    return
  }
  func.func @transform_0(%arg0: i32) -> (i32, i32) {
    %c0_i32 = arith.constant 0 : i32
    %c0_i32_0 = arith.constant 0 : i32
    return %arg0, %c0_i32 : i32, i32
  }
  func.func @transform_1(%arg0: i32) -> (i32, i32) {
    %c0_i32 = arith.constant 0 : i32
    %c0_i32_0 = arith.constant 0 : i32
    return %arg0, %c0_i32 : i32, i32
  }
}

</mosaic_0001>

<bundles_post_ra>
// kernel: tpu_custom_call.1
= control target key start
LH: loop header
LB: loop body
LE: loop exit
PB: predicated region body
PF: predicated region fallthrough
CT: control target
= control target key end

     0   :  { %6 = vsyncpa [#allocation3], 0  ;;  %s62_s9 = smov [#allocation2]   ;;  %s79_s0 = inlined_call_operand.hbm [shape: f32[8,256], index: 0, kind: input, shape index: {}]   ;;  %s80_s1 = inlined_call_operand.vmem [shape: f32[8,1], index: 1, kind: output, shape index: {}]  }
   0x1   :  { %s12_s8 = sshll.u32 %s79_s0, 4  ;;  %s14_s10 = sshll.u32 %s62_s9, 4  ;;  %s13_s8 = int_to_ptr.hbm [resolvable:$true] %s12_s8  ;;  %s15_s10 = int_to_ptr.vmem [resolvable:$true] %s14_s10 }
   0x2   :  { %17 = dma.hbm_to_vmem [thread:$0]  %s13_s8, 256, %s15_s10, [#allocation3]  }
   0x3   :  { %60 = dma.done.wait [#allocation3], 256  }
   0x4   :  { %61 = vsyncadd [#allocation3], 4294967040  ;;  %v22_v0 = vld [vmem:[#allocation2] sm:$0xff]  ;;  %v23_v1 = vld [vmem:[#allocation2 + $0x8] sm:$0xff]  ;;  %vm28_vm0 = vcmask 7168  }
   0x5   :  { %v24_v2 = vadd.f32 %v23_v1, %v22_v0 }
   0x7   :  { %25 = vadd.xlane.f32.xlu0 %v24_v2 }
  0x7a   :  { %v26_v3 = vpop.xlane.xlu0 %25 }
  0x7b   :  { %v27_v4 = vmul.f32 0.00390625, %v26_v3 }
  0x7d   :  { %29 = vst.msk [vmem:[%s80_s1] sm:$0xff] %vm28_vm0, %v27_v4 }
  0x7e   :  { %34 = vsyncpa [#allocation3], 1 }

</bundles_post_ra>
